<compile_context>
chip_gen: v5e
topology: v5e:2x2
jax: 0.10.0
libtpu: 0.0.40
codegen_flags: <defaults>
</compile_context>

<pallas_src>
import functools

import jax
import jax.numpy as jnp
from jax import lax
from jax.experimental import pallas as pl
from jax.experimental.pallas import tpu as pltpu

DILATION_PARAM = 1.4
NEG_SLOPE = 0.01
BN_EPS = 1e-5


def _choose_tb(batch, lane_per_elem, target_lanes=1024, max_lanes=2048):
    """Pick the per-step batch tile TB (TB | B).  Aim for TB*lane_per_elem payload lanes
    in [target_lanes, max_lanes]; prefer keeping G = B // TB >= 2 so the 'parallel' grid
    axis can shard across two TensorCores (v7x) when that does not shrink the payload
    lanes below half of what a single step would get."""
    divisors = [tb for tb in range(1, batch + 1) if batch % tb == 0]
    fits = [tb for tb in divisors if tb * lane_per_elem <= max_lanes] or divisors[:1]
    reach = [tb for tb in fits if tb * lane_per_elem >= target_lanes]
    tb = reach[0] if reach else fits[-1]
    if batch // tb < 2:                         # keep >= 2 grid steps if affordable
        alts = [t for t in fits if batch // t >= 2
                and 2 * t * lane_per_elem >= min(tb * lane_per_elem, target_lanes)]
        if alts:
            tb = alts[-1]
    return tb


def make_cnn_kernel(num_layers, F, dilations, cins, L, d_max, TB, C_ctx):
    """Fused per-grid-step kernel: all conv layers + folded-BN shift + leaky_relu +
    channel concat + incremental global max pool, entirely in VMEM."""
    Lp = L + 2 * d_max          # per-element padded segment width
    TBL = TB * Lp               # payload lane width per grid step

    def kernel(*refs):
        x_ref = refs[0]                       # (1, C0, W)   bf16, pre-padded layout
        w_refs = refs[1:1 + num_layers]       # (F, 3*cin_i) bf16, BN scale folded, taps stacked
        shift_ref = refs[1 + num_layers]      # (num_layers, F, 1) f32 folded BN shift
        mask_ref = refs[2 + num_layers]       # (1, TBL) f32 validity mask (1 real / 0 margin)
        out_ref = refs[3 + num_layers]        # (1, num_layers*F, TB) f32 transposed output
        ctx_ref = refs[4 + num_layers]        # VMEM (C_ctx, W) bf16 context (channel cat)
        rhs_ref = refs[5 + num_layers]        # VMEM (3*cin_max, TBL) bf16 stacked conv RHS

        # Zero the context buffer's outer halo: it is read through the +/-d tap windows
        # of layers >= 1 but never written by the payload stores.  Unconditional so it is
        # correct under megacore grid sharding; cost is a 2*d_max-lane store.
        ctx_ref[:, :d_max] = jnp.zeros((C_ctx, d_max), ctx_ref.dtype)
        ctx_ref[:, d_max + TBL:d_max + TBL + d_max] = jnp.zeros((C_ctx, d_max), ctx_ref.dtype)

        # Hoisted validity compare (margins of each element's segment -> False).
        valid = mask_ref[...] > 0.0            # (1, TBL) bool

        for i in range(num_layers):
            d = dilations[i]
            cin = cins[i]

            # Stack the three +/-d-shifted (cin, TBL) tap windows along sublanes via
            # ref-sliced loads at static offsets, so the whole layer is ONE MXU matmul.
            for k in range(3):
                start = d_max + (k - 1) * d
                if i == 0:
                    rhs_ref[k * cin:(k + 1) * cin, :] = x_ref[0, :, start:start + TBL]
                else:
                    # torch.cat(context_list, dim=1) == first i*F rows of the context buffer
                    rhs_ref[k * cin:(k + 1) * cin, :] = ctx_ref[:cin, start:start + TBL]

            # Dilated conv1d (kernel=3, padding=d, no bias) with folded BN scale:
            # (F, 3*cin) x (3*cin, TB*Lp) -> (F, TB*Lp), f32 accumulation on the MXU.
            acc = jnp.dot(w_refs[i][...], rhs_ref[:3 * cin, :],
                          preferred_element_type=jnp.float32)

            # BatchNorm shift + leaky_relu fused in one f32 pass (dropout = identity, eval).
            act = acc + shift_ref[i]
            act = jnp.maximum(act, NEG_SLOPE * act)
            # TODO(synk): training-mode dropout RNG masking not implemented (eval semantics).

            # Incremental global max pool: reduce each element's L real lanes while `act`
            # is live in vregs, then ONE (F, TB) store per layer into the transposed
            # output block (no identity-matmul transpose, no extra scratch).
            cols = [jnp.max(act[:, t * Lp + d_max:t * Lp + d_max + L],
                            axis=1, keepdims=True) for t in range(TB)]
            layer_max = cols[0] if TB == 1 else jnp.concatenate(cols, axis=1)
            out_ref[0, i * F:(i + 1) * F, :] = layer_max

            # Append this layer's output to the context buffer with margin lanes forced
            # to exact zero (the next layer's conv zero-padding).  The last layer's
            # output is never re-read, so its store is skipped.
            if i + 1 < num_layers:
                ctx_ref[i * F:(i + 1) * F, d_max:d_max + TBL] = jnp.where(
                    valid, act, 0.0).astype(ctx_ref.dtype)

    return kernel


def cnn_forward(x, conv_weights, bn_scale, bn_shift, *, num_filters, dilations,
                compute_dtype=jnp.bfloat16):
    """x: (B, D1, D2) float32.  Returns (B, num_layers*num_filters), matching the
    PyTorch forward with flatten_flag=True (eval mode)."""
    # process(): 3-D input -> permute(0, 2, 1)  => (B, C0, L)
    xp = jnp.transpose(x, (0, 2, 1)).astype(jnp.float32)
    B, C0, L = xp.shape
    num_layers = len(dilations)
    F = num_filters
    C_total = num_layers * F
    cins = [C0] + [i * F for i in range(1, num_layers)]
    d_max = max(dilations)
    Lp = L + 2 * d_max
    C_ctx = max(F * (num_layers - 1), F)     # last layer's output is never re-read

    # Per-step batch tile: 1024-2048 payload lanes, capped by a VMEM budget on the
    # per-lane bf16 rows (input block + context + stacked RHS); prefer G >= 2 (v7x).
    bytes_per_lane = 2 * (3 * max(cins) + C_ctx + C0)
    lane_cap = max(Lp, min(2048, (8 << 20) // bytes_per_lane))
    TB = _choose_tb(B, Lp, target_lanes=1024, max_lanes=lane_cap)
    G = B // TB
    TBL = TB * Lp
    W = TBL + 2 * d_max          # per-step lane extent incl. outer halo

    # Batched, padded lane layout: element t of a grid step occupies payload lanes
    # [t*Lp, (t+1)*Lp), real data in the middle L lanes, zero margins of width d_max on
    # both sides; the d_max outer halo keeps the +/-d tap windows in bounds.
    xq = jnp.pad(xp, ((0, 0), (0, 0), (d_max, d_max)))                  # (B, C0, Lp)
    xq = xq.reshape(G, TB, C0, Lp).transpose(0, 2, 1, 3).reshape(G, C0, TBL)
    x_lay = jnp.pad(xq, ((0, 0), (0, 0), (d_max, d_max))).astype(compute_dtype)  # (G, C0, W)

    # Fold the BatchNorm scale into the conv weights (inference) and stack the three
    # taps along the contraction dim (tap-major) to match the stacked-RHS row order.
    w_stk = []
    for i, w in enumerate(conv_weights):
        wf = w.astype(jnp.float32) * bn_scale[i][:, :, None]            # (F, cin, 3)
        wf = jnp.transpose(wf, (0, 2, 1)).reshape(F, 3 * cins[i])       # (F, 3*cin)
        w_stk.append(wf.astype(compute_dtype))
    shift = bn_shift.astype(jnp.float32)                                # (num_layers, F, 1)

    # Payload-validity mask, built once host-side (no per-step mask-building loop).
    pos = jnp.arange(TBL, dtype=jnp.int32) % Lp
    maskf = ((pos >= d_max) & (pos < d_max + L)).astype(jnp.float32)[None, :]  # (1, TBL)

    kernel = make_cnn_kernel(num_layers, F, tuple(dilations), cins, L, d_max, TB, C_ctx)

    in_specs = [pl.BlockSpec((1, C0, W), lambda g: (g, 0, 0))]
    for w in w_stk:
        in_specs.append(pl.BlockSpec(w.shape, lambda g: (0, 0)))
    in_specs.append(pl.BlockSpec(shift.shape, lambda g: (0, 0, 0)))
    in_specs.append(pl.BlockSpec(maskf.shape, lambda g: (0, 0)))

    flops = 2 * B * L * 3 * F * sum(cins)
    bytes_accessed = (x_lay.size * x_lay.dtype.itemsize
                      + sum(w.size * w.dtype.itemsize for w in w_stk)
                      + shift.size * 4 + maskf.size * 4 + B * C_total * 4)

    out = pl.pallas_call(
        kernel,
        out_shape=jax.ShapeDtypeStruct((G, C_total, TB), jnp.float32),
        grid_spec=pltpu.PrefetchScalarGridSpec(
            num_scalar_prefetch=0,
            grid=(G,),
            in_specs=in_specs,
            out_specs=pl.BlockSpec((1, C_total, TB), lambda g: (g, 0, 0)),
            scratch_shapes=[
                pltpu.VMEM((C_ctx, W), compute_dtype),            # context (channel-cat)
                pltpu.VMEM((3 * max(cins), TBL), compute_dtype),  # stacked conv RHS
            ],
        ),
        compiler_params=pltpu.CompilerParams(
            dimension_semantics=("parallel",),
            vmem_limit_bytes=32 * 1024 * 1024),
        cost_estimate=pl.CostEstimate(
            flops=flops, transcendentals=0, bytes_accessed=bytes_accessed),
    )(x_lay, *w_stk, shift, maskf)

    # (G, C_total, TB) -> (B, C_total): one tiny wrapper-side transpose keeps all
    # in-kernel stores lane-contiguous and avoids any in-kernel transpose.
    return jnp.transpose(out, (0, 2, 1)).reshape(B, C_total)


def reference_forward(x, conv_weights, bn_scale, bn_shift, *, dilations,
                      compute_dtype=jnp.bfloat16):
    """Plain-JAX reference mirroring the PyTorch forward (eval mode) with the same
    mixed precision as the kernel (bf16 weights/activations, f32 accumulation)."""
    rnd = lambda a: a.astype(compute_dtype).astype(jnp.float32)
    cur = rnd(jnp.transpose(x, (0, 2, 1)).astype(jnp.float32))          # (B, C0, L)
    context, maxes = [], []
    for i, d in enumerate(dilations):
        if i > 0:
            cur = jnp.concatenate(context, axis=1)
        w = rnd(conv_weights[i].astype(jnp.float32) * bn_scale[i][:, :, None])
        y = lax.conv_general_dilated(
            cur, w, window_strides=(1,), padding=[(d, d)], rhs_dilation=(d,),
            dimension_numbers=("NCH", "OIH", "NCH"),
            precision=lax.Precision.HIGHEST)
        y = y + bn_shift[i][None]
        y = jnp.where(y >= 0, y, NEG_SLOPE * y)
        maxes.append(jnp.max(y, axis=-1))          # (B, F)
        context.append(rnd(y))
    return jnp.concatenate(maxes, axis=1)          # (B, num_layers*F)


if __name__ == "__main__":
    # Small, deterministic configuration.
    B, D1, D2 = 2, 16, 32          # input x: (B, D1, D2); process -> (B, C0=32, L=16)
    num_filters = 8
    num_layers = 4
    num_output_classes = 10        # fc_layer is built but never applied in forward
    dilations = [int(DILATION_PARAM ** i) for i in range(num_layers)]  # [1, 1, 1, 2]

    key = jax.random.PRNGKey(0)
    keys = jax.random.split(key, 1 + 5 * num_layers)
    x = jax.random.normal(keys[0], (B, D1, D2), dtype=jnp.float32)

    C0 = D2
    cins = [C0] + [i * num_filters for i in range(1, num_layers)]

    conv_weights = []
    gammas, betas, means, variances = [], [], [], []
    for i in range(num_layers):
        kw, kg, kb, km, kv = keys[1 + 5 * i: 1 + 5 * (i + 1)]
        fan_in = cins[i] * 3
        bound = 1.0 / (float(fan_in) ** 0.5)
        conv_weights.append(jax.random.uniform(
            kw, (num_filters, cins[i], 3), jnp.float32, minval=-bound, maxval=bound))
        gammas.append(jax.random.uniform(kg, (num_filters,), jnp.float32, 0.5, 1.5))
        betas.append(0.1 * jax.random.normal(kb, (num_filters,), jnp.float32))
        means.append(0.1 * jax.random.normal(km, (num_filters,), jnp.float32))
        variances.append(jax.random.uniform(kv, (num_filters,), jnp.float32, 0.5, 1.5))

    gamma = jnp.stack(gammas)          # (num_layers, F)
    beta = jnp.stack(betas)
    mean = jnp.stack(means)
    var = jnp.stack(variances)
    inv_std = lax.rsqrt(var + BN_EPS)
    bn_scale = (gamma * inv_std)[:, :, None]                      # (num_layers, F, 1)
    bn_shift = (beta - mean * gamma * inv_std)[:, :, None]        # (num_layers, F, 1)

    run = functools.partial(cnn_forward, num_filters=num_filters, dilations=dilations)
    out = run(x, conv_weights, bn_scale, bn_shift)
    out = jax.block_until_ready(out)

    ref = reference_forward(x, conv_weights, bn_scale, bn_shift, dilations=dilations)
    assert out.shape == (B, num_layers * num_filters), out.shape
    max_err = float(jnp.max(jnp.abs(out - ref)))
    assert max_err < 1e-3, f"mismatch vs reference: {max_err}"

    print("KERNEL_OK")
</pallas_src>

<mosaic_0001>
module attributes {stable_mosaic.version = 11 : i64} {
  func.func @kernel(%arg0: i32, %arg1: memref<1x32x24xbf16, #tpu.memory_space<vmem>>, %arg2: memref<8x96xbf16, #tpu.memory_space<vmem>>, %arg3: memref<8x24xbf16, #tpu.memory_space<vmem>>, %arg4: memref<8x48xbf16, #tpu.memory_space<vmem>>, %arg5: memref<8x72xbf16, #tpu.memory_space<vmem>>, %arg6: memref<4x8x1xf32, #tpu.memory_space<vmem>>, %arg7: memref<1x20xf32, #tpu.memory_space<vmem>>, %arg8: memref<1x32x1xf32, #tpu.memory_space<vmem>>, %arg9: memref<24x24xbf16, #tpu.memory_space<vmem>>, %arg10: memref<96x20xbf16, #tpu.memory_space<vmem>>) attributes {dimension_semantics = [#tpu.dimension_semantics<parallel>], iteration_bounds = array<i64: 2>, scalar_prefetch = 0 : i64, scratch_operands = 2 : i64, tpu.core_type = #tpu.core_type<tc>, window_params = [{transform_indices = @transform_0, window_bounds = array<i64: 1, 32, 24>}, {pipeline_mode = #tpu.pipeline_mode<synchronous>, transform_indices = @transform_1, window_bounds = array<i64: 8, 96>}, {pipeline_mode = #tpu.pipeline_mode<synchronous>, transform_indices = @transform_2, window_bounds = array<i64: 8, 24>}, {pipeline_mode = #tpu.pipeline_mode<synchronous>, transform_indices = @transform_3, window_bounds = array<i64: 8, 48>}, {pipeline_mode = #tpu.pipeline_mode<synchronous>, transform_indices = @transform_4, window_bounds = array<i64: 8, 72>}, {pipeline_mode = #tpu.pipeline_mode<synchronous>, transform_indices = @transform_5, window_bounds = array<i64: 4, 8, 1>}, {pipeline_mode = #tpu.pipeline_mode<synchronous>, transform_indices = @transform_6, window_bounds = array<i64: 1, 20>}, {transform_indices = @transform_7, window_bounds = array<i64: 1, 32, 1>}]} {
    %cst = arith.constant 0.000000e+00 : bf16
    %0 = vector.broadcast %cst : bf16 to vector<24x2xbf16>
    %c0 = arith.constant 0 : index
    %c0_0 = arith.constant 0 : index
    %1 = vector.load %arg9[%c0, %c0_0] : memref<24x24xbf16, #tpu.memory_space<vmem>>, vector<24x2xbf16>
    tpu.vector_store %arg9[%c0, %c0_0], %0 {strides = array<i32>} : memref<24x24xbf16, #tpu.memory_space<vmem>>, vector<24x2xbf16>,
    %cst_1 = arith.constant 0.000000e+00 : bf16
    %2 = vector.broadcast %cst_1 : bf16 to vector<24x2xbf16>
    %c0_2 = arith.constant 0 : index
    %c22 = arith.constant 22 : index
    %3 = vector.load %arg9[%c0_2, %c22] : memref<24x24xbf16, #tpu.memory_space<vmem>>, vector<24x2xbf16>
    tpu.vector_store %arg9[%c0_2, %c22], %2 {strides = array<i32>} : memref<24x24xbf16, #tpu.memory_space<vmem>>, vector<24x2xbf16>,
    %c0_3 = arith.constant 0 : index
    %c0_4 = arith.constant 0 : index
    %4 = vector.load %arg7[%c0_3, %c0_4] : memref<1x20xf32, #tpu.memory_space<vmem>>, vector<1x20xf32>
    %cst_5 = arith.constant 0.000000e+00 : f32
    %5 = vector.broadcast %cst_5 : f32 to vector<1x20xf32>
    %6 = arith.cmpf ogt, %4, %5 : vector<1x20xf32>
    %c0_6 = arith.constant 0 : index
    %c0_7 = arith.constant 0 : index
    %c1 = arith.constant 1 : index
    %7 = vector.load %arg1[%c0_6, %c0_7, %c1] : memref<1x32x24xbf16, #tpu.memory_space<vmem>>, vector<1x32x20xbf16>
    %8 = vector.shape_cast %7 : vector<1x32x20xbf16> to vector<32x20xbf16>
    %c0_8 = arith.constant 0 : index
    %c0_9 = arith.constant 0 : index
    %9 = vector.load %arg10[%c0_8, %c0_9] : memref<96x20xbf16, #tpu.memory_space<vmem>>, vector<32x20xbf16>
    tpu.vector_store %arg10[%c0_8, %c0_9], %8 {strides = array<i32>} : memref<96x20xbf16, #tpu.memory_space<vmem>>, vector<32x20xbf16>,
    %c0_10 = arith.constant 0 : index
    %c0_11 = arith.constant 0 : index
    %c2 = arith.constant 2 : index
    %10 = vector.load %arg1[%c0_10, %c0_11, %c2] : memref<1x32x24xbf16, #tpu.memory_space<vmem>>, vector<1x32x20xbf16>
    %11 = vector.shape_cast %10 : vector<1x32x20xbf16> to vector<32x20xbf16>
    %c32 = arith.constant 32 : index
    %c0_12 = arith.constant 0 : index
    %12 = vector.load %arg10[%c32, %c0_12] : memref<96x20xbf16, #tpu.memory_space<vmem>>, vector<32x20xbf16>
    tpu.vector_store %arg10[%c32, %c0_12], %11 {strides = array<i32>} : memref<96x20xbf16, #tpu.memory_space<vmem>>, vector<32x20xbf16>,
    %c0_13 = arith.constant 0 : index
    %c0_14 = arith.constant 0 : index
    %c3 = arith.constant 3 : index
    %13 = vector.load %arg1[%c0_13, %c0_14, %c3] : memref<1x32x24xbf16, #tpu.memory_space<vmem>>, vector<1x32x20xbf16>
    %14 = vector.shape_cast %13 : vector<1x32x20xbf16> to vector<32x20xbf16>
    %c64 = arith.constant 64 : index
    %c0_15 = arith.constant 0 : index
    %15 = vector.load %arg10[%c64, %c0_15] : memref<96x20xbf16, #tpu.memory_space<vmem>>, vector<32x20xbf16>
    tpu.vector_store %arg10[%c64, %c0_15], %14 {strides = array<i32>} : memref<96x20xbf16, #tpu.memory_space<vmem>>, vector<32x20xbf16>,
    %c0_16 = arith.constant 0 : index
    %c0_17 = arith.constant 0 : index
    %16 = vector.load %arg2[%c0_16, %c0_17] : memref<8x96xbf16, #tpu.memory_space<vmem>>, vector<8x96xbf16>
    %c0_18 = arith.constant 0 : index
    %c0_19 = arith.constant 0 : index
    %17 = vector.load %arg10[%c0_18, %c0_19] : memref<96x20xbf16, #tpu.memory_space<vmem>>, vector<96x20xbf16>
    %cst_20 = arith.constant dense<0.000000e+00> : vector<8x20xf32>
    %18 = tpu.matmul %16, %17, %cst_20 {dimension_numbers = #tpu.dot_dimension_numbers<[1], [0], [0], [1], [0, 0, 1, 1], [], []>} : vector<8x96xbf16>, vector<96x20xbf16>, vector<8x20xf32> -> vector<8x20xf32>
    %c0_21 = arith.constant 0 : index
    %c0_22 = arith.constant 0 : index
    %c0_23 = arith.constant 0 : index
    %19 = vector.load %arg6[%c0_21, %c0_22, %c0_23] : memref<4x8x1xf32, #tpu.memory_space<vmem>>, vector<1x8x1xf32>
    %20 = vector.shape_cast %19 : vector<1x8x1xf32> to vector<8x1xf32>
    %21 = vector.broadcast %20 : vector<8x1xf32> to vector<8x20xf32>
    %22 = arith.addf %18, %21 : vector<8x20xf32>
    %cst_24 = arith.constant 0.00999999977 : f32
    %23 = vector.broadcast %cst_24 : f32 to vector<8x20xf32>
    %24 = arith.mulf %23, %22 : vector<8x20xf32>
    %25 = arith.maximumf %22, %24 : vector<8x20xf32>
    %26 = vector.extract_strided_slice %25 {offsets = [0, 2], sizes = [8, 16], strides = [1, 1]} : vector<8x20xf32> to vector<8x16xf32>
    %cst_25 = arith.constant dense<0xFF800000> : vector<8xf32>
    %27 = vector.multi_reduction <maximumf>, %26, %cst_25 [1] : vector<8x16xf32> to vector<8xf32>
    %28 = vector.shape_cast %27 : vector<8xf32> to vector<8x1xf32>
    %c0_26 = arith.constant 0 : index
    %c0_27 = arith.constant 0 : index
    %c0_28 = arith.constant 0 : index
    %29 = vector.load %arg8[%c0_26, %c0_27, %c0_28] : memref<1x32x1xf32, #tpu.memory_space<vmem>>, vector<1x8x1xf32>
    %30 = vector.shape_cast %29 : vector<1x8x1xf32> to vector<8x1xf32>
    %31 = vector.shape_cast %28 : vector<8x1xf32> to vector<1x8x1xf32>
    tpu.vector_store %arg8[%c0_26, %c0_27, %c0_28], %31 {strides = array<i32>} : memref<1x32x1xf32, #tpu.memory_space<vmem>>, vector<1x8x1xf32>,
    %cst_29 = arith.constant 0.000000e+00 : f32
    %32 = vector.shape_cast %6 : vector<1x20xi1> to vector<1x20xi1>
    %33 = vector.broadcast %32 : vector<1x20xi1> to vector<8x20xi1>
    %34 = vector.broadcast %cst_29 : f32 to vector<8x20xf32>
    %35 = arith.select %33, %25, %34 : vector<8x20xi1>, vector<8x20xf32>
    %36 = arith.truncf %35 : vector<8x20xf32> to vector<8x20xbf16>
    %c0_30 = arith.constant 0 : index
    %c2_31 = arith.constant 2 : index
    %37 = vector.load %arg9[%c0_30, %c2_31] : memref<24x24xbf16, #tpu.memory_space<vmem>>, vector<8x20xbf16>
    tpu.vector_store %arg9[%c0_30, %c2_31], %36 {strides = array<i32>} : memref<24x24xbf16, #tpu.memory_space<vmem>>, vector<8x20xbf16>,
    %c0_32 = arith.constant 0 : index
    %c1_33 = arith.constant 1 : index
    %38 = vector.load %arg9[%c0_32, %c1_33] : memref<24x24xbf16, #tpu.memory_space<vmem>>, vector<8x20xbf16>
    %c0_34 = arith.constant 0 : index
    %c0_35 = arith.constant 0 : index
    %39 = vector.load %arg10[%c0_34, %c0_35] : memref<96x20xbf16, #tpu.memory_space<vmem>>, vector<8x20xbf16>
    tpu.vector_store %arg10[%c0_34, %c0_35], %38 {strides = array<i32>} : memref<96x20xbf16, #tpu.memory_space<vmem>>, vector<8x20xbf16>,
    %c0_36 = arith.constant 0 : index
    %c2_37 = arith.constant 2 : index
    %40 = vector.load %arg9[%c0_36, %c2_37] : memref<24x24xbf16, #tpu.memory_space<vmem>>, vector<8x20xbf16>
    %c8 = arith.constant 8 : index
    %c0_38 = arith.constant 0 : index
    %41 = vector.load %arg10[%c8, %c0_38] : memref<96x20xbf16, #tpu.memory_space<vmem>>, vector<8x20xbf16>
    tpu.vector_store %arg10[%c8, %c0_38], %40 {strides = array<i32>} : memref<96x20xbf16, #tpu.memory_space<vmem>>, vector<8x20xbf16>,
    %c0_39 = arith.constant 0 : index
    %c3_40 = arith.constant 3 : index
    %42 = vector.load %arg9[%c0_39, %c3_40] : memref<24x24xbf16, #tpu.memory_space<vmem>>, vector<8x20xbf16>
    %c16 = arith.constant 16 : index
    %c0_41 = arith.constant 0 : index
    %43 = vector.load %arg10[%c16, %c0_41] : memref<96x20xbf16, #tpu.memory_space<vmem>>, vector<8x20xbf16>
    tpu.vector_store %arg10[%c16, %c0_41], %42 {strides = array<i32>} : memref<96x20xbf16, #tpu.memory_space<vmem>>, vector<8x20xbf16>,
    %c0_42 = arith.constant 0 : index
    %c0_43 = arith.constant 0 : index
    %44 = vector.load %arg3[%c0_42, %c0_43] : memref<8x24xbf16, #tpu.memory_space<vmem>>, vector<8x24xbf16>
    %c0_44 = arith.constant 0 : index
    %c0_45 = arith.constant 0 : index
    %45 = vector.load %arg10[%c0_44, %c0_45] : memref<96x20xbf16, #tpu.memory_space<vmem>>, vector<24x20xbf16>
    %cst_46 = arith.constant dense<0.000000e+00> : vector<8x20xf32>
    %46 = tpu.matmul %44, %45, %cst_46 {dimension_numbers = #tpu.dot_dimension_numbers<[1], [0], [0], [1], [0, 0, 1, 1], [], []>} : vector<8x24xbf16>, vector<24x20xbf16>, vector<8x20xf32> -> vector<8x20xf32>
    %c1_47 = arith.constant 1 : index
    %c0_48 = arith.constant 0 : index
    %c0_49 = arith.constant 0 : index
    %47 = vector.load %arg6[%c1_47, %c0_48, %c0_49] : memref<4x8x1xf32, #tpu.memory_space<vmem>>, vector<1x8x1xf32>
    %48 = vector.shape_cast %47 : vector<1x8x1xf32> to vector<8x1xf32>
    %49 = vector.broadcast %48 : vector<8x1xf32> to vector<8x20xf32>
    %50 = arith.addf %46, %49 : vector<8x20xf32>
    %cst_50 = arith.constant 0.00999999977 : f32
    %51 = vector.broadcast %cst_50 : f32 to vector<8x20xf32>
    %52 = arith.mulf %51, %50 : vector<8x20xf32>
    %53 = arith.maximumf %50, %52 : vector<8x20xf32>
    %54 = vector.extract_strided_slice %53 {offsets = [0, 2], sizes = [8, 16], strides = [1, 1]} : vector<8x20xf32> to vector<8x16xf32>
    %cst_51 = arith.constant dense<0xFF800000> : vector<8xf32>
    %55 = vector.multi_reduction <maximumf>, %54, %cst_51 [1] : vector<8x16xf32> to vector<8xf32>
    %56 = vector.shape_cast %55 : vector<8xf32> to vector<8x1xf32>
    %c0_52 = arith.constant 0 : index
    %c8_53 = arith.constant 8 : index
    %c0_54 = arith.constant 0 : index
    %57 = vector.load %arg8[%c0_52, %c8_53, %c0_54] : memref<1x32x1xf32, #tpu.memory_space<vmem>>, vector<1x8x1xf32>
    %58 = vector.shape_cast %57 : vector<1x8x1xf32> to vector<8x1xf32>
    %59 = vector.shape_cast %56 : vector<8x1xf32> to vector<1x8x1xf32>
    tpu.vector_store %arg8[%c0_52, %c8_53, %c0_54], %59 {strides = array<i32>} : memref<1x32x1xf32, #tpu.memory_space<vmem>>, vector<1x8x1xf32>,
    %cst_55 = arith.constant 0.000000e+00 : f32
    %60 = vector.shape_cast %6 : vector<1x20xi1> to vector<1x20xi1>
    %61 = vector.broadcast %60 : vector<1x20xi1> to vector<8x20xi1>
    %62 = vector.broadcast %cst_55 : f32 to vector<8x20xf32>
    %63 = arith.select %61, %53, %62 : vector<8x20xi1>, vector<8x20xf32>
    %64 = arith.truncf %63 : vector<8x20xf32> to vector<8x20xbf16>
    %c8_56 = arith.constant 8 : index
    %c2_57 = arith.constant 2 : index
    %65 = vector.load %arg9[%c8_56, %c2_57] : memref<24x24xbf16, #tpu.memory_space<vmem>>, vector<8x20xbf16>
    tpu.vector_store %arg9[%c8_56, %c2_57], %64 {strides = array<i32>} : memref<24x24xbf16, #tpu.memory_space<vmem>>, vector<8x20xbf16>,
    %c0_58 = arith.constant 0 : index
    %c1_59 = arith.constant 1 : index
    %66 = vector.load %arg9[%c0_58, %c1_59] : memref<24x24xbf16, #tpu.memory_space<vmem>>, vector<16x20xbf16>
    %c0_60 = arith.constant 0 : index
    %c0_61 = arith.constant 0 : index
    %67 = vector.load %arg10[%c0_60, %c0_61] : memref<96x20xbf16, #tpu.memory_space<vmem>>, vector<16x20xbf16>
    tpu.vector_store %arg10[%c0_60, %c0_61], %66 {strides = array<i32>} : memref<96x20xbf16, #tpu.memory_space<vmem>>, vector<16x20xbf16>,
    %c0_62 = arith.constant 0 : index
    %c2_63 = arith.constant 2 : index
    %68 = vector.load %arg9[%c0_62, %c2_63] : memref<24x24xbf16, #tpu.memory_space<vmem>>, vector<16x20xbf16>
    %c16_64 = arith.constant 16 : index
    %c0_65 = arith.constant 0 : index
    %69 = vector.load %arg10[%c16_64, %c0_65] : memref<96x20xbf16, #tpu.memory_space<vmem>>, vector<16x20xbf16>
    tpu.vector_store %arg10[%c16_64, %c0_65], %68 {strides = array<i32>} : memref<96x20xbf16, #tpu.memory_space<vmem>>, vector<16x20xbf16>,
    %c0_66 = arith.constant 0 : index
    %c3_67 = arith.constant 3 : index
    %70 = vector.load %arg9[%c0_66, %c3_67] : memref<24x24xbf16, #tpu.memory_space<vmem>>, vector<16x20xbf16>
    %c32_68 = arith.constant 32 : index
    %c0_69 = arith.constant 0 : index
    %71 = vector.load %arg10[%c32_68, %c0_69] : memref<96x20xbf16, #tpu.memory_space<vmem>>, vector<16x20xbf16>
    tpu.vector_store %arg10[%c32_68, %c0_69], %70 {strides = array<i32>} : memref<96x20xbf16, #tpu.memory_space<vmem>>, vector<16x20xbf16>,
    %c0_70 = arith.constant 0 : index
    %c0_71 = arith.constant 0 : index
    %72 = vector.load %arg4[%c0_70, %c0_71] : memref<8x48xbf16, #tpu.memory_space<vmem>>, vector<8x48xbf16>
    %c0_72 = arith.constant 0 : index
    %c0_73 = arith.constant 0 : index
    %73 = vector.load %arg10[%c0_72, %c0_73] : memref<96x20xbf16, #tpu.memory_space<vmem>>, vector<48x20xbf16>
    %cst_74 = arith.constant dense<0.000000e+00> : vector<8x20xf32>
    %74 = tpu.matmul %72, %73, %cst_74 {dimension_numbers = #tpu.dot_dimension_numbers<[1], [0], [0], [1], [0, 0, 1, 1], [], []>} : vector<8x48xbf16>, vector<48x20xbf16>, vector<8x20xf32> -> vector<8x20xf32>
    %c2_75 = arith.constant 2 : index
    %c0_76 = arith.constant 0 : index
    %c0_77 = arith.constant 0 : index
    %75 = vector.load %arg6[%c2_75, %c0_76, %c0_77] : memref<4x8x1xf32, #tpu.memory_space<vmem>>, vector<1x8x1xf32>
    %76 = vector.shape_cast %75 : vector<1x8x1xf32> to vector<8x1xf32>
    %77 = vector.broadcast %76 : vector<8x1xf32> to vector<8x20xf32>
    %78 = arith.addf %74, %77 : vector<8x20xf32>
    %cst_78 = arith.constant 0.00999999977 : f32
    %79 = vector.broadcast %cst_78 : f32 to vector<8x20xf32>
    %80 = arith.mulf %79, %78 : vector<8x20xf32>
    %81 = arith.maximumf %78, %80 : vector<8x20xf32>
    %82 = vector.extract_strided_slice %81 {offsets = [0, 2], sizes = [8, 16], strides = [1, 1]} : vector<8x20xf32> to vector<8x16xf32>
    %cst_79 = arith.constant dense<0xFF800000> : vector<8xf32>
    %83 = vector.multi_reduction <maximumf>, %82, %cst_79 [1] : vector<8x16xf32> to vector<8xf32>
    %84 = vector.shape_cast %83 : vector<8xf32> to vector<8x1xf32>
    %c0_80 = arith.constant 0 : index
    %c16_81 = arith.constant 16 : index
    %c0_82 = arith.constant 0 : index
    %85 = vector.load %arg8[%c0_80, %c16_81, %c0_82] : memref<1x32x1xf32, #tpu.memory_space<vmem>>, vector<1x8x1xf32>
    %86 = vector.shape_cast %85 : vector<1x8x1xf32> to vector<8x1xf32>
    %87 = vector.shape_cast %84 : vector<8x1xf32> to vector<1x8x1xf32>
    tpu.vector_store %arg8[%c0_80, %c16_81, %c0_82], %87 {strides = array<i32>} : memref<1x32x1xf32, #tpu.memory_space<vmem>>, vector<1x8x1xf32>,
    %cst_83 = arith.constant 0.000000e+00 : f32
    %88 = vector.shape_cast %6 : vector<1x20xi1> to vector<1x20xi1>
    %89 = vector.broadcast %88 : vector<1x20xi1> to vector<8x20xi1>
    %90 = vector.broadcast %cst_83 : f32 to vector<8x20xf32>
    %91 = arith.select %89, %81, %90 : vector<8x20xi1>, vector<8x20xf32>
    %92 = arith.truncf %91 : vector<8x20xf32> to vector<8x20xbf16>
    %c16_84 = arith.constant 16 : index
    %c2_85 = arith.constant 2 : index
    %93 = vector.load %arg9[%c16_84, %c2_85] : memref<24x24xbf16, #tpu.memory_space<vmem>>, vector<8x20xbf16>
    tpu.vector_store %arg9[%c16_84, %c2_85], %92 {strides = array<i32>} : memref<24x24xbf16, #tpu.memory_space<vmem>>, vector<8x20xbf16>,
    %c0_86 = arith.constant 0 : index
    %c0_87 = arith.constant 0 : index
    %94 = vector.load %arg9[%c0_86, %c0_87] : memref<24x24xbf16, #tpu.memory_space<vmem>>, vector<24x20xbf16>
    %c0_88 = arith.constant 0 : index
    %c0_89 = arith.constant 0 : index
    %95 = vector.load %arg10[%c0_88, %c0_89] : memref<96x20xbf16, #tpu.memory_space<vmem>>, vector<24x20xbf16>
    tpu.vector_store %arg10[%c0_88, %c0_89], %94 {strides = array<i32>} : memref<96x20xbf16, #tpu.memory_space<vmem>>, vector<24x20xbf16>,
    %c0_90 = arith.constant 0 : index
    %c2_91 = arith.constant 2 : index
    %96 = vector.load %arg9[%c0_90, %c2_91] : memref<24x24xbf16, #tpu.memory_space<vmem>>, vector<24x20xbf16>
    %c24 = arith.constant 24 : index
    %c0_92 = arith.constant 0 : index
    %97 = vector.load %arg10[%c24, %c0_92] : memref<96x20xbf16, #tpu.memory_space<vmem>>, vector<24x20xbf16>
    tpu.vector_store %arg10[%c24, %c0_92], %96 {strides = array<i32>} : memref<96x20xbf16, #tpu.memory_space<vmem>>, vector<24x20xbf16>,
    %c0_93 = arith.constant 0 : index
    %c4 = arith.constant 4 : index
    %98 = vector.load %arg9[%c0_93, %c4] : memref<24x24xbf16, #tpu.memory_space<vmem>>, vector<24x20xbf16>
    %c48 = arith.constant 48 : index
    %c0_94 = arith.constant 0 : index
    %99 = vector.load %arg10[%c48, %c0_94] : memref<96x20xbf16, #tpu.memory_space<vmem>>, vector<24x20xbf16>
    tpu.vector_store %arg10[%c48, %c0_94], %98 {strides = array<i32>} : memref<96x20xbf16, #tpu.memory_space<vmem>>, vector<24x20xbf16>,
    %c0_95 = arith.constant 0 : index
    %c0_96 = arith.constant 0 : index
    %100 = vector.load %arg5[%c0_95, %c0_96] : memref<8x72xbf16, #tpu.memory_space<vmem>>, vector<8x72xbf16>
    %c0_97 = arith.constant 0 : index
    %c0_98 = arith.constant 0 : index
    %101 = vector.load %arg10[%c0_97, %c0_98] : memref<96x20xbf16, #tpu.memory_space<vmem>>, vector<72x20xbf16>
    %cst_99 = arith.constant dense<0.000000e+00> : vector<8x20xf32>
    %102 = tpu.matmul %100, %101, %cst_99 {dimension_numbers = #tpu.dot_dimension_numbers<[1], [0], [0], [1], [0, 0, 1, 1], [], []>} : vector<8x72xbf16>, vector<72x20xbf16>, vector<8x20xf32> -> vector<8x20xf32>
    %c3_100 = arith.constant 3 : index
    %c0_101 = arith.constant 0 : index
    %c0_102 = arith.constant 0 : index
    %103 = vector.load %arg6[%c3_100, %c0_101, %c0_102] : memref<4x8x1xf32, #tpu.memory_space<vmem>>, vector<1x8x1xf32>
    %104 = vector.shape_cast %103 : vector<1x8x1xf32> to vector<8x1xf32>
    %105 = vector.broadcast %104 : vector<8x1xf32> to vector<8x20xf32>
    %106 = arith.addf %102, %105 : vector<8x20xf32>
    %cst_103 = arith.constant 0.00999999977 : f32
    %107 = vector.broadcast %cst_103 : f32 to vector<8x20xf32>
    %108 = arith.mulf %107, %106 : vector<8x20xf32>
    %109 = arith.maximumf %106, %108 : vector<8x20xf32>
    %110 = vector.extract_strided_slice %109 {offsets = [0, 2], sizes = [8, 16], strides = [1, 1]} : vector<8x20xf32> to vector<8x16xf32>
    %cst_104 = arith.constant dense<0xFF800000> : vector<8xf32>
    %111 = vector.multi_reduction <maximumf>, %110, %cst_104 [1] : vector<8x16xf32> to vector<8xf32>
    %112 = vector.shape_cast %111 : vector<8xf32> to vector<8x1xf32>
    %c0_105 = arith.constant 0 : index
    %c24_106 = arith.constant 24 : index
    %c0_107 = arith.constant 0 : index
    %113 = vector.load %arg8[%c0_105, %c24_106, %c0_107] : memref<1x32x1xf32, #tpu.memory_space<vmem>>, vector<1x8x1xf32>
    %114 = vector.shape_cast %113 : vector<1x8x1xf32> to vector<8x1xf32>
    %115 = vector.shape_cast %112 : vector<8x1xf32> to vector<1x8x1xf32>
    tpu.vector_store %arg8[%c0_105, %c24_106, %c0_107], %115 {strides = array<i32>} : memref<1x32x1xf32, #tpu.memory_space<vmem>>, vector<1x8x1xf32>,
    return
  }
  func.func @transform_0(%arg0: i32) -> (i32, i32, i32) {
    %c0_i32 = arith.constant 0 : i32
    %c0_i32_0 = arith.constant 0 : i32
    %c0_i32_1 = arith.constant 0 : i32
    return %arg0, %c0_i32, %c0_i32_0 : i32, i32, i32
  }
  func.func @transform_1(%arg0: i32) -> (i32, i32) {
    %c0_i32 = arith.constant 0 : i32
    %c0_i32_0 = arith.constant 0 : i32
    %c0_i32_1 = arith.constant 0 : i32
    return %c0_i32, %c0_i32_0 : i32, i32
  }
  func.func @transform_2(%arg0: i32) -> (i32, i32) {
    %c0_i32 = arith.constant 0 : i32
    %c0_i32_0 = arith.constant 0 : i32
    %c0_i32_1 = arith.constant 0 : i32
    return %c0_i32, %c0_i32_0 : i32, i32
  }
  func.func @transform_3(%arg0: i32) -> (i32, i32) {
    %c0_i32 = arith.constant 0 : i32
    %c0_i32_0 = arith.constant 0 : i32
    %c0_i32_1 = arith.constant 0 : i32
    return %c0_i32, %c0_i32_0 : i32, i32
  }
  func.func @transform_4(%arg0: i32) -> (i32, i32) {
    %c0_i32 = arith.constant 0 : i32
    %c0_i32_0 = arith.constant 0 : i32
    %c0_i32_1 = arith.constant 0 : i32
    return %c0_i32, %c0_i32_0 : i32, i32
  }
  func.func @transform_5(%arg0: i32) -> (i32, i32, i32) {
    %c0_i32 = arith.constant 0 : i32
    %c0_i32_0 = arith.constant 0 : i32
    %c0_i32_1 = arith.constant 0 : i32
    %c0_i32_2 = arith.constant 0 : i32
    return %c0_i32, %c0_i32_0, %c0_i32_1 : i32, i32, i32
  }
  func.func @transform_6(%arg0: i32) -> (i32, i32) {
    %c0_i32 = arith.constant 0 : i32
    %c0_i32_0 = arith.constant 0 : i32
    %c0_i32_1 = arith.constant 0 : i32
    return %c0_i32, %c0_i32_0 : i32, i32
  }
  func.func @transform_7(%arg0: i32) -> (i32, i32, i32) {
    %c0_i32 = arith.constant 0 : i32
    %c0_i32_0 = arith.constant 0 : i32
    %c0_i32_1 = arith.constant 0 : i32
    return %arg0, %c0_i32, %c0_i32_0 : i32, i32, i32
  }
}

</mosaic_0001>

<bundles_post_ra>
// kernel: tpu_custom_call.1
= control target key start
LH: loop header
LB: loop body
LE: loop exit
PB: predicated region body
PF: predicated region fallthrough
CT: control target
= control target key end

     0   :  { %s952_s24 = smov 0   ;;  %s1093_s0 = inlined_call_operand.vmem [shape: bf16[2,32,24], index: 0, kind: input, shape index: {}]   ;;  %s1094_s1 = inlined_call_operand.vmem [shape: bf16[8,96], index: 1, kind: input, shape index: {}]   ;;  %s1095_s2 = inlined_call_operand.vmem [shape: bf16[8,24], index: 2, kind: input, shape index: {}]   ;;  %s1096_s3 = inlined_call_operand.vmem [shape: bf16[8,48], index: 3, kind: input, shape index: {}]   ;;  %s1097_s4 = inlined_call_operand.vmem [shape: bf16[8,72], index: 4, kind: input, shape index: {}]   ;;  %s1098_s5 = inlined_call_operand.vmem [shape: f32[4,8,1], index: 5, kind: input, shape index: {}]   ;;  %s1099_s6 = inlined_call_operand.vmem [shape: f32[1,20], index: 6, kind: input, shape index: {}]   ;;  %s1100_s7 = inlined_call_operand.vmem [shape: f32[2,32,1], index: 7, kind: output, shape index: {}]  }
   0x1 LB: > { %s791_s25 = sadd.s32 4294967295, %s904_s24   ;;  %p795_p0 = scmp.ge.s32.totalorder %s904_s24, 1  ;;  %s904_s24 = sphi %s952_s24, %s17_s24  }
   0x2   : > { %p237_p1 = scmp.lt.s32.totalorder %s904_s24, 3 }
   0x4   : > { %p238_p2 = pnand %p795_p0, %p237_p1 }
   0x5   : > { %p269_p3 = scmp.lt.s32.totalorder (!%p238_p2), %s791_s25, 1  ;;  %s906_s30 = smov (!%p238_p2), 125  }
   0x6   : > { %241 = sbr.rel (%p238_p2) target bundleno = 1615 (0x64f), region = 48  ;;  %s907_s8 = smov (!%p238_p2), 126  }
   0x7   : > { %s908_s9 = smov (!%p238_p2), 127   ;;  %s910_s18 = smov (!%p238_p2), 2  }
   0x8   : > { %s911_s23 = smov (!%p238_p2), 124  }
   0xb   : > { %s1104_s25 = smov (!%p269_p3, %s791_s25), 1  ;;  %vm310_vm0 = vcmask 158720   ;;  %v376_v20 = vld [vmem:[%s1098_s5] sm:$0xff]  ;;  %v909_v21 = vmov 0   ;;  %v825_v25 = vld [vmem:[%s1098_s5 + $0x8] sm:$0xff]  ;;  %vm418_vm1 = vcmask 785408  }
   0xc   : > { %s865_s26 = sshll.u32 %s1104_s25, 4  ;;  %895 = vset.pattern.permute.xlu0 %v909_v21  ;;  %896 = vset.pattern.permute.xlu2 %v909_v21  ;;  %v363_v33 = vld [vmem:[%s1094_s1] sm:$0xf]  ;;  %vm280_vm2 = vcmask 11264   ;;  %vm284_vm3 = vcmask 191664   ;;  %vm452_vm6 = vcmask 175120  }
   0xd   : > { %s273_s29 = scalar_lea.vmem %s1093_s0, %s865_s26  ;;  %897 = vset.pattern.permute.xlu1 %v909_v21  ;;  %281 = vst.msk [vmem:[#allocation2] sm:$0xf] %vm280_vm2, %v909_v21  ;;  %v288_v34 = vld [vmem:[%s1099_s6] sm:$0x1]  ;;  %vm496_vm7 = vcmask 1043456   ;;  %vm492_vm8 = vcmask 195584  }
   0xe   : > { %v341_v0 = vld [vmem:[%s273_s29 + $0x8] sm:$0xf]  ;;  %v339_v1 = vld [vmem:[%s273_s29] sm:$0xf]  ;;  %v342_v3 = vld [vmem:[%s273_s29 + $0xc] sm:$0xf] }
   0xf   : > { %351 = vrot.lane.b32.xlu0 %v341_v0, %s906_s30  ;;  %347 = vrot.lane.b32.xlu1 %v339_v1, %s906_s30  ;;  %v317_v2 = vld [vmem:[%s273_s29 + $0x8] sm:$0xf]  ;;  %v340_v4 = vld [vmem:[%s273_s29 + $0x4] sm:$0xf]  ;;  %285 = vst.msk [vmem:[#allocation2] sm:$0xf] %vm284_vm3, %v909_v21 }
  0x10   : > { %327 = vrot.lane.b32.xlu2 %v317_v2, %s907_s8  ;;  %v318_v5 = vld [vmem:[%s273_s29 + $0xc] sm:$0xf]  ;;  %v316_v6 = vld [vmem:[%s273_s29 + $0x4] sm:$0xf]  ;;  %v315_v7 = vld [vmem:[%s273_s29] sm:$0xf] }
  0x11   : > { %v292_v8 = vld [vmem:[%s273_s29 + $0x8] sm:$0xf]  ;;  %v293_v9 = vld [vmem:[%s273_s29 + $0xc] sm:$0xf]  ;;  %v290_v10 = vld [vmem:[%s273_s29] sm:$0xf] }
  0x12   : > { %v291_v11 = vld [vmem:[%s273_s29 + $0x4] sm:$0xf]  ;;  %282 = vst.msk [vmem:[#allocation2 + $0x4] sm:$0xf] %vm280_vm2, %v909_v21  ;;  %vm289_vm4 = vcmp.gt.f32.partialorder %v288_v34, 0.0  ;;  %vm594_vm9 = vcmask 392192  }
  0x13   : > { %283 = vst.msk [vmem:[#allocation2 + $0x8] sm:$0xf] %vm280_vm2, %v909_v21  ;;  %v443_v35 = vsel %vm289_vm4, 1, %v909_v21  ;;  %v472_v60 = vld [vmem:[%s1095_s2] sm:$0xf]  ;;  %vm437_vm10 = vcmask 146448  }
  0x14   : > { %286 = vst.msk [vmem:[#allocation2 + $0x4] sm:$0xf] %vm284_vm3, %v909_v21  ;;  %v444_v38 = vperm.slane %v443_v35, 0  ;;  %vm441_vm11 = vcmask 7168   ;;  %vm710_vm12 = vcmask 588800  }
  0x15   : > { %287 = vst.msk [vmem:[#allocation2 + $0x8] sm:$0xf] %vm284_vm3, %v909_v21 }
  0x16   : > { %vm1002_vm5 = vcmp.eq.s32.totalorder %v444_v38, 1 }
  0x17   : > { %353 = vrot.lane.b32.xlu0 %v342_v3, %s906_s30  ;;  %349 = vrot.lane.b32.xlu1 %v340_v4, %s906_s30 }
  0x18   : > { %329 = vrot.lane.b32.xlu2 %v318_v5, %s907_s8 }
  0x1f   : > { %325 = vrot.lane.b32.xlu1 %v316_v6, %s907_s8  ;;  %323 = vrot.lane.b32.xlu0 %v315_v7, %s907_s8 }
  0x20   : > { %302 = vrot.lane.b32.xlu2 %v292_v8, %s908_s9 }
  0x27   : > { %304 = vrot.lane.b32.xlu0 %v293_v9, %s908_s9  ;;  %298 = vrot.lane.b32.xlu1 %v290_v10, %s908_s9 }
  0x28   : > { %300 = vrot.lane.b32.xlu2 %v291_v11, %s908_s9  ;;  %v831_v11 = vld [vmem:[%s1098_s5 + $0x10] sm:$0xff] }
  0x2f   : > { %379 = vperm.xlu0 %895, %v376_v20  }
  0x37   : > { %480 = vperm.xlu0 %895, %v825_v25   ;;  %v562_v25 = vld [vmem:[%s1096_s3] sm:$0xf] }
  0x6a   : > { %v328_v12 = vpop.permute.xlu2 %327 }
  0x6b   : > { %337 = vst.msk [vmem:[#allocation3 + $0x18] sm:$0xf] %vm310_vm0, %v328_v12 }
  0x72   : > { %v330_v13 = vpop.permute.xlu2 %329 }
  0x73   : > { %338 = vst.msk [vmem:[#allocation3 + $0x1c] sm:$0xf] %vm310_vm0, %v330_v13 }
  0x7a   : > { %v303_v14 = vpop.permute.xlu2 %302  ;;  %v870_v28 = vld [vmem:[#allocation3 + $0x18] sm:$0xff] }
  0x7b   : > { %313 = vst.msk [vmem:[#allocation3 + $0x8] sm:$0xf] %vm310_vm0, %v303_v14 }
  0x81   : > { %v352_v15 = vpop.permute.xlu0 %351  ;;  %v348_v16 = vpop.permute.xlu1 %347 }
  0x82   : > { %361 = vst.msk [vmem:[#allocation3 + $0x28] sm:$0xf] %vm310_vm0, %v352_v15  ;;  %v301_v17 = vpop.permute.xlu2 %300 }
  0x83   : > { %359 = vst.msk [vmem:[#allocation3 + $0x20] sm:$0xf] %vm310_vm0, %v348_v16 }
  0x84   : > { %312 = vst.msk [vmem:[#allocation3 + $0x4] sm:$0xf] %vm310_vm0, %v301_v17 }
  0x89   : > { %v354_v18 = vpop.permute.xlu0 %353  ;;  %v350_v19 = vpop.permute.xlu1 %349 }
  0x8a   : > { %362 = vst.msk [vmem:[#allocation3 + $0x2c] sm:$0xf] %vm310_vm0, %v354_v18 }
  0x8b   : > { %360 = vst.msk [vmem:[#allocation3 + $0x24] sm:$0xf] %vm310_vm0, %v350_v19 }
  0x91   : > { %v326_v22 = vpop.permute.xlu1 %325  ;;  %v324_v23 = vpop.permute.xlu0 %323  ;;  %v872_v24 = vld [vmem:[#allocation3 + $0x28] sm:$0xff] }
  0x92   : > { %336 = vst.msk [vmem:[#allocation3 + $0x14] sm:$0xf] %vm310_vm0, %v326_v22  ;;  %424 = vmatpush.bf16.msra.mxu0 %v872_v24  ;;  %v871_v26 = vld [vmem:[#allocation3 + $0x20] sm:$0xff] }
  0x93   : > { %335 = vst.msk [vmem:[#allocation3 + $0x10] sm:$0xf] %vm310_vm0, %v324_v23 }
  0x96   : > { %425 = vmatpush.bf16.msra.mxu0 %v871_v26 }
  0x99   : > { %v305_v27 = vpop.permute.xlu0 %304  ;;  %v299_v29 = vpop.permute.xlu1 %298 }
  0x9a   : > { %314 = vst.msk [vmem:[#allocation3 + $0xc] sm:$0xf] %vm310_vm0, %v305_v27  ;;  %426 = vmatpush.bf16.msra.mxu0 %v870_v28  ;;  %v869_v30 = vld [vmem:[#allocation3 + $0x10] sm:$0xff] }
  0x9b   : > { %311 = vst.msk [vmem:[#allocation3] sm:$0xf] %vm310_vm0, %v299_v29 }
  0x9e   : > { %427 = vmatpush.bf16.msra.mxu0 %v869_v30 }
  0xa1   : > { %v868_v31 = vld [vmem:[#allocation3 + $0x8] sm:$0xff]  ;;  %v380_v36 = vpop.permute.xlu0 %379 }
  0xa2   : > { %428 = vmatpush.bf16.msra.mxu0 %v868_v31  ;;  %v867_v32 = vld [vmem:[#allocation3] sm:$0xff] }
  0xa6   : > { %429 = vmatpush.bf16.msra.mxu0 %v867_v32 }
  0xa9   : > { %824 = vmatmul.msk.bf16.vlgmr.msra.gmra.mxu0 %vm418_vm1, %v363_v33  ;;  %v481_v61 = vpop.permute.xlu0 %480 }
 0x126   : > { %v431_v37 = vpop.f32.mrf.mxu0 }
 0x127   : > { %v432_v39 = vadd.f32 %v431_v37, %v380_v36 }
 0x129   : > { %v435_v40 = vmul.f32 0.01, %v432_v39 }
 0x12b   : > { %v1006_v42 = vmax.f32 %v432_v39, %v435_v40 }
 0x12d   : > { %v446_v43 = vsel %vm1002_vm5, %v1006_v42, 0.0 }
 0x12e   : > { %v433_v44 = vpop.f32.mrf.mxu0  ;;  %v447_v45 = vpack.c.bf16 %v446_v43, %v446_v43 }
 0x12f   : > { %v845_v44 = vld [vmem:[%s1098_s5 + $0x18] sm:$0xff] }
 0x130   : > { %449 = vrot.lane.b32.xlu1 %v447_v45, %s910_s18  ;;  %v438_v45 = vsel %vm437_vm10, %v1006_v42, -inf }
 0x1a2   : > { %v450_v46 = vpop.permute.xlu1 %449 }
 0x1a3   : > { %453 = vst.msk [vmem:[#allocation2] sm:$0xf] %vm452_vm6, %v450_v46 }
 0x1aa   : > { %v466_v47 = vld [vmem:[#allocation2] sm:$0xf] }
 0x1ab   : > { %v454_v48 = vld [vmem:[#allocation2] sm:$0xf]  ;;  %468 = vrot.lane.b32.xlu2 %v466_v47, %s906_s30 }
 0x1ac   : > { %456 = vrot.lane.b32.xlu1 %v454_v48, %s908_s9  ;;  %v460_v49 = vld [vmem:[#allocation2] sm:$0xf] }
 0x1ad   : > { %v550_v50 = vld [vmem:[#allocation2] sm:$0xf] }
 0x1ae   : > { %v538_v5 = vld [vmem:[#allocation2] sm:$0xf] }
 0x1af   : > { %v526_v12 = vld [vmem:[#allocation2] sm:$0xf] }
 0x1b0   : > { %v648_v13 = vld [vmem:[#allocation2] sm:$0xf] }
 0x1b1   : > { %v624_v21 = vld [vmem:[#allocation2] sm:$0xf] }
 0x1b2   : > { %v630_v34 = vld [vmem:[#allocation2] sm:$0xf] }
 0x1b3   : > { %462 = vrot.lane.b32.xlu2 %v460_v49, %s907_s8 }
 0x1bb   : > { %554 = vrot.lane.b32.xlu2 %v550_v50, %s906_s30 }
 0x205   : > { %v469_v51 = vpop.permute.xlu2 %468 }
 0x206   : > { %471 = vst.msk [vmem:[#allocation3 + $0x8] sm:$0xf] %vm310_vm0, %v469_v51 }
 0x20d   : > { %v463_v52 = vpop.permute.xlu2 %462  ;;  %v475_v53 = vld [vmem:[#allocation3 + $0x8] sm:$0xf] }
 0x20e   : > { %465 = vst.msk [vmem:[#allocation3 + $0x4] sm:$0xf] %vm310_vm0, %v463_v52  ;;  %v488_v54 = vunpack.c.l.b16 %v475_v53 }
 0x210   : > { %v490_v55 = vpack.c.b16 %v488_v54, %v488_v54 }
 0x212   : > { %v498_v56 = vsel %vm496_vm7, %v490_v55, 0 }
 0x213   : > { %506 = vmatpush.bf16.msra.mxu1 %v498_v56 }
 0x215   : > { %v555_v57 = vpop.permute.xlu2 %554 }
 0x216   : > { %560 = vst.msk [vmem:[#allocation3 + $0x10] sm:$0xf] %vm310_vm0, %v555_v57 }
 0x21e   : > { %v457_v58 = vpop.permute.xlu1 %456 }
 0x21f   : > { %459 = vst.msk [vmem:[#allocation3] sm:$0xf] %vm310_vm0, %v457_v58  ;;  %v666_v58 = vld [vmem:[%s1097_s4] sm:$0xf] }
 0x226   : > { %v873_v59 = vld [vmem:[#allocation3] sm:$0xff] }
 0x227   : > { %507 = vmatpush.bf16.msra.mxu1 %v873_v59 }
 0x22a   : > { %830 = vmatmul.msk.bf16.vlgmr.msra.gmra.mxu1 %vm492_vm8, %v472_v60 }
 0x2a7   : > { %v509_v62 = vpop.f32.mrf.mxu1 }
 0x2a8   : > { %v510_v63 = vadd.f32 %v509_v62, %v481_v61 }
 0x2aa   : > { %v513_v0 = vmul.f32 0.01, %v510_v63 }
 0x2ac   : > { %v514_v1 = vmax.f32 %v510_v63, %v513_v0 }
 0x2ae   : > { %v519_v2 = vsel %vm1002_vm5, %v514_v1, 0.0  ;;  %v515_v35 = vsel %vm437_vm10, %v514_v1, -inf }
 0x2af   : > { %v511_v3 = vpop.f32.mrf.mxu1  ;;  %v520_v4 = vpack.c.bf16 %v519_v2, %v519_v2 }
 0x2b1   : > { %522 = vrot.lane.b32.xlu1 %v520_v4, %s910_s18 }
 0x2b9   : > { %542 = vrot.lane.b32.xlu1 %v538_v5, %s907_s8 }
 0x323   : > { %v523_v6 = vpop.permute.xlu1 %522 }
 0x324   : > { %525 = vst.msk [vmem:[#allocation2 + $0x4] sm:$0xf] %vm452_vm6, %v523_v6 }
 0x32b   : > { %v543_v7 = vpop.permute.xlu1 %542  ;;  %v551_v8 = vld [vmem:[#allocation2 + $0x4] sm:$0xf] }
 0x32c   : > { %v539_v9 = vld [vmem:[#allocation2 + $0x4] sm:$0xf]  ;;  %548 = vst.msk [vmem:[#allocation3 + $0x8] sm:$0xf] %vm310_vm0, %v543_v7  ;;  %556 = vrot.lane.b32.xlu0 %v551_v8, %s906_s30  ;;  %s866_s30 = sshll.u32 %s1104_s25, 5 }
 0x32d   : > { %v527_v10 = vld [vmem:[#allocation2 + $0x4] sm:$0xf]  ;;  %544 = vrot.lane.b32.xlu2 %v539_v9, %s907_s8  ;;  %s1071_s11 = scalar_lea.vmem %s1100_s7, %s866_s30 }
 0x32e   : > { %532 = vrot.lane.b32.xlu1 %v527_v10, %s908_s9  ;;  %v625_v24 = vld [vmem:[#allocation2 + $0x4] sm:$0xf] }
 0x32f   : > { %v649_v33 = vld [vmem:[#allocation2 + $0x4] sm:$0xf] }
 0x330   : > { %v631_v43 = vld [vmem:[#allocation2 + $0x4] sm:$0xf] }
 0x334   : > { %530 = vrot.lane.b32.xlu0 %v526_v12, %s908_s9 }
 0x335   : > { %573 = vperm.xlu2 %896, %v831_v11  }
 0x33d   : > { %654 = vrot.lane.b32.xlu2 %v648_v13, %s911_s23 }
 0x387   : > { %v545_v14 = vpop.permute.xlu2 %544 }
 0x388   : > { %549 = vst.msk [vmem:[#allocation3 + $0xc] sm:$0xf] %vm310_vm0, %v545_v14 }
 0x38f   : > { %v574_v15 = vpop.permute.xlu2 %573  ;;  %v875_v22 = vld [vmem:[#allocation3 + $0x8] sm:$0xff] }
 0x397   : > { %v655_v16 = vpop.permute.xlu2 %654 }
 0x398   : > { %663 = vst.msk [vmem:[#allocation3 + $0x18] sm:$0xf] %vm310_vm0, %v655_v16 }
 0x39e   : > { %v557_v17 = vpop.permute.xlu0 %556 }
 0x39f   : > { %561 = vst.msk [vmem:[#allocation3 + $0x14] sm:$0xf] %vm310_vm0, %v557_v17 }
 0x3a0   : > { %v533_v18 = vpop.permute.xlu1 %532 }
 0x3a1   : > { %537 = vst.msk [vmem:[#allocation3 + $0x4] sm:$0xf] %vm310_vm0, %v533_v18 }
 0x3a6   : > { %v531_v19 = vpop.permute.xlu0 %530  ;;  %v876_v20 = vld [vmem:[#allocation3 + $0x10] sm:$0xff] }
 0x3a7   : > { %536 = vst.msk [vmem:[#allocation3] sm:$0xf] %vm310_vm0, %v531_v19  ;;  %603 = vmatpush.bf16.msra.mxu2 %v876_v20 }
 0x3a8   : > { %627 = vst.msk [vmem:[#allocation3] sm:$0xf] %vm310_vm0, %v624_v21 }
 0x3ab   : > { %604 = vmatpush.bf16.msra.mxu2 %v875_v22 }
 0x3af   : > { %v874_v23 = vld [vmem:[#allocation3] sm:$0xff] }
 0x3b0   : > { %628 = vst.msk [vmem:[#allocation3 + $0x4] sm:$0xf] %vm310_vm0, %v625_v24  ;;  %605 = vmatpush.bf16.msra.mxu2 %v874_v23 }
 0x3b3   : > { %844 = vmatmul.msk.bf16.vlgmr.msra.gmra.mxu2 %vm594_vm9, %v562_v25 }
 0x3b7   : > { %v877_v57 = vld [vmem:[#allocation3] sm:$0xff] }
 0x436   : > { %v607_v26 = vpop.f32.mrf.mxu2 }
 0x437   : > { %v608_v27 = vadd.f32 %v607_v26, %v574_v15 }
 0x439   : > { %v611_v28 = vmul.f32 0.01, %v608_v27 }
 0x43b   : > { %v612_v29 = vmax.f32 %v608_v27, %v611_v28 }
 0x43d   : > { %v617_v30 = vsel %vm1002_vm5, %v612_v29, 0.0  ;;  %v613_v47 = vsel %vm437_vm10, %v612_v29, -inf }
 0x43e   : > { %v609_v31 = vpop.f32.mrf.mxu2  ;;  %v618_v32 = vpack.c.bf16 %v617_v30, %v617_v30 }
 0x440   : > { %620 = vrot.lane.b32.xlu0 %v618_v32, %s910_s18 }
 0x448   : > { %656 = vrot.lane.b32.xlu0 %v649_v33, %s911_s23 }
 0x450   : > { %636 = vrot.lane.b32.xlu0 %v630_v34, %s907_s8 }
 0x47a   : > { %516 = vmax.xlane.f32.xlu0 %v515_v35 }
 0x4b2   : > { %v621_v36 = vpop.permute.xlu0 %620 }
 0x4b3   : > { %623 = vst.msk [vmem:[#allocation2 + $0x8] sm:$0xf] %vm452_vm6, %v621_v36 }
 0x4ba   : > { %v626_v37 = vld [vmem:[#allocation2 + $0x8] sm:$0xf]  ;;  %v657_v38 = vpop.permute.xlu0 %656 }
 0x4bb   : > { %v650_v39 = vld [vmem:[#allocation2 + $0x8] sm:$0xf]  ;;  %629 = vst.msk [vmem:[#allocation3 + $0x8] sm:$0xf] %vm310_vm0, %v626_v37 }
 0x4bc   : > { %v632_v40 = vld [vmem:[#allocation2 + $0x8] sm:$0xf]  ;;  %658 = vrot.lane.b32.xlu1 %v650_v39, %s911_s23  ;;  %664 = vst.msk [vmem:[#allocation3 + $0x1c] sm:$0xf] %vm310_vm0, %v657_v38 }
 0x4bd   : > { %640 = vrot.lane.b32.xlu2 %v632_v40, %s907_s8 }
 0x4c2   : > { %v637_v41 = vpop.permute.xlu0 %636 }
 0x4c3   : > { %645 = vst.msk [vmem:[#allocation3 + $0xc] sm:$0xf] %vm310_vm0, %v637_v41  ;;  %v880_v54 = vld [vmem:[#allocation3 + $0x18] sm:$0xff] }
 0x4c4   : > { %638 = vrot.lane.b32.xlu1 %v631_v43, %s907_s8 }
 0x4ca   : > { %v878_v56 = vld [vmem:[#allocation3 + $0x8] sm:$0xff] }
 0x4cc   : > { %680 = vperm.xlu1 %897, %v845_v44  }
 0x4e6   : > { %439 = vmax.xlane.f32.xlu2 %v438_v45 }
 0x4ed   : > { %v517_v46 = vpop.xlane.xlu0 %516 }
 0x4ee   : > { %518 = vst.msk [vmem:[%s1071_s11 + $0x8] sm:$0xff] %vm441_vm11, %v517_v46 }
 0x4f6   : > { %614 = vmax.xlane.f32.xlu1 %v613_v47 }
 0x517   : > { %v641_v48 = vpop.permute.xlu2 %640 }
 0x518   : > { %647 = vst.msk [vmem:[#allocation3 + $0x14] sm:$0xf] %vm310_vm0, %v641_v48 }
 0x52e   : > { %v659_v49 = vpop.permute.xlu1 %658 }
 0x52f   : > { %665 = vst.msk [vmem:[#allocation3 + $0x20] sm:$0xf] %vm310_vm0, %v659_v49 }
 0x536   : > { %v639_v42 = vpop.permute.xlu1 %638  ;;  %v675_v50 = vld [vmem:[#allocation3 + $0x20] sm:$0xf] }
 0x537   : > { %646 = vst.msk [vmem:[#allocation3 + $0x10] sm:$0xf] %vm310_vm0, %v639_v42  ;;  %v700_v51 = vunpack.c.l.b16 %v675_v50 }
 0x539   : > { %v705_v52 = vpack.c.b16 %v700_v51, %v700_v51 }
 0x53b   : > { %v715_v53 = vsel %vm496_vm7, %v705_v52, 0 }
 0x53c   : > { %720 = vmatpush.bf16.msra.mxu3 %v715_v53 }
 0x53e   : > { %v879_v55 = vld [vmem:[#allocation3 + $0x10] sm:$0xff]  ;;  %v681_v60 = vpop.permute.xlu1 %680 }
 0x540   : > { %721 = vmatpush.bf16.msra.mxu3 %v880_v54 }
 0x544   : > { %722 = vmatpush.bf16.msra.mxu3 %v879_v55 }
 0x548   : > { %723 = vmatpush.bf16.msra.mxu3 %v878_v56 }
 0x54c   : > { %724 = vmatpush.bf16.msra.mxu3 %v877_v57 }
 0x54f   : > { %862 = vmatmul.msk.bf16.vlgmr.msra.gmra.mxu3 %vm710_vm12, %v666_v58 }
 0x559   : > { %v440_v59 = vpop.xlane.xlu2 %439 }
 0x55a   : > { %442 = vst.msk [vmem:[%s1071_s11] sm:$0xff] %vm441_vm11, %v440_v59 }
 0x569   : > { %v615_v61 = vpop.xlane.xlu1 %614 }
 0x56a   : > { %616 = vst.msk [vmem:[%s1071_s11 + $0x10] sm:$0xff] %vm441_vm11, %v615_v61 }
 0x5d2   : > { %v726_v62 = vpop.f32.mrf.mxu3 }
 0x5d3   : > { %v727_v63 = vadd.f32 %v726_v62, %v681_v60 }
 0x5d5   : > { %v730_v0 = vmul.f32 0.01, %v727_v63 }
 0x5d7   : > { %v731_v1 = vmax.f32 %v727_v63, %v730_v0 }
 0x5d9   : > { %v732_v2 = vsel %vm437_vm10, %v731_v1, -inf }
 0x5da   : > { %v728_v3 = vpop.f32.mrf.mxu3  ;;  %733 = vmax.xlane.f32.xlu2 %v732_v2 }
 0x64d   : > { %v734_v4 = vpop.xlane.xlu2 %733 }
 0x64e   : > { %735 = vst.msk [vmem:[%s1071_s11 + $0x18] sm:$0xff] %vm441_vm11, %v734_v4 }
 0x64f PF: > { %s17_s24 = sadd.s32 1, %s904_s24  }
 0x650   : > { %p14_p4 = scmp.ge.s32.totalorder %s17_s24, 4  }
 0x652   :  { %16 = sbr.rel (!%p14_p4) target bundleno = 1 (0x1), region = 81 }

</bundles_post_ra>
